<compile_context>
chip_gen: v7x
topology: tpu7x:2x2x1
jax: 0.10.0
libtpu: 0.0.40
codegen_flags: <defaults>
</compile_context>

<pallas_src>
import jax
import jax.numpy as jnp
from jax.experimental import pallas as pl
from jax.experimental.pallas import tpu as pltpu


# ---------------------------------------------------------------------------
# Kernel
# ---------------------------------------------------------------------------
def ptw_kernel(x_ref, w1_ref, b1_ref, w2_ref, b2_ref, out_ref):
    # --- calc_hidden_feature: linear (bf16 MXU operands, f32 acc) + f32 tanh -
    x = x_ref[...].astype(jnp.bfloat16)                       # (TM, Din)
    h = jnp.tanh(
        jnp.dot(x, w1_ref[...], preferred_element_type=jnp.float32)
        + b1_ref[...]                                          # (1, H) f32 broadcast
    )
    # --- calc_output_from_hidden_feature: linear + log_softmax (f32) ---------
    z = (
        jnp.dot(h.astype(jnp.bfloat16), w2_ref[...],
                preferred_element_type=jnp.float32)
        + b2_ref[...]                                          # (1, P) f32
    )
    m = jnp.max(z, axis=-1, keepdims=True)
    lse = jnp.log(jnp.sum(jnp.exp(z - m), axis=-1, keepdims=True)) + m
    out_ref[...] = (z - lse).astype(out_ref.dtype)             # log-probabilities


# ---------------------------------------------------------------------------
# Wrapper
# ---------------------------------------------------------------------------
def _round_up(x, m):
    return ((x + m - 1) // m) * m


def _cdiv(a, b):
    return (a + b - 1) // b


def _pick_row_tile(n):
    """Row tile: multiple of 8, capped at 2048, and >= 2 grid steps when n > 8
    so the 'parallel' grid axis can actually shard across v7x's two cores."""
    cap = 2048
    if n <= 8:
        return n                      # single full-dim tile (always legal)
    tm = min(cap, _round_up(_cdiv(n, 2), 8))
    return max(8, tm)


@jax.jit
def phone_type_writer_forward(x, w1, b1, w2, b2):
    """x: (T_total, Din) packed frames -> (T_total, P) phone log-probs (f32)."""
    n, din = x.shape
    h_dim = w1.shape[1]
    p = w2.shape[1]

    tm = _pick_row_tile(n)
    grid = (_cdiv(n, tm),)

    # Only the tiny weights are touched in the wrapper (one-off bf16 cast);
    # the activation slab is streamed by the kernel exactly once, un-padded.
    w1b = w1.astype(jnp.bfloat16)
    w2b = w2.astype(jnp.bfloat16)
    b1f = b1.astype(jnp.float32).reshape(1, h_dim)
    b2f = b2.astype(jnp.float32).reshape(1, p)

    cost = pl.CostEstimate(
        flops=2 * n * (din * h_dim + h_dim * p),
        transcendentals=n * (h_dim + p),
        bytes_accessed=(n * din * x.dtype.itemsize          # input slab (read once)
                        + w1b.size * 2 + w2b.size * 2       # resident bf16 weights
                        + b1f.size * 4 + b2f.size * 4       # f32 biases
                        + n * p * 4),                       # f32 output slab
    )

    # Actual VMEM need: double-buffered streamed x/out tiles + resident weights.
    vmem_need = (2 * tm * (din * 4 + p * 4)
                 + (din * h_dim + h_dim * p) * 2
                 + (h_dim + p) * 4)
    vmem_limit = int(min(max(4 * vmem_need, 8 << 20), 64 << 20))

    out = pl.pallas_call(
        ptw_kernel,
        out_shape=jax.ShapeDtypeStruct((n, p), jnp.float32),
        grid=grid,
        in_specs=[
            pl.BlockSpec((tm, din), lambda i: (i, 0)),       # streamed row tile (f32)
            pl.BlockSpec((din, h_dim), lambda i: (0, 0)),    # resident weights
            pl.BlockSpec((1, h_dim), lambda i: (0, 0)),
            pl.BlockSpec((h_dim, p), lambda i: (0, 0)),
            pl.BlockSpec((1, p), lambda i: (0, 0)),
        ],
        out_specs=pl.BlockSpec((tm, p), lambda i: (i, 0)),   # direct (n, P) writeback
        compiler_params=pltpu.CompilerParams(
            dimension_semantics=("parallel",),               # 2 TCs on v7x; harmless elsewhere
            vmem_limit_bytes=vmem_limit,
        ),
        cost_estimate=cost,
    )(x, w1b, b1f, w2b, b2f)

    return out


# ---------------------------------------------------------------------------
# References
# ---------------------------------------------------------------------------
def reference_forward_f32(x, w1, b1, w2, b2):
    h = jnp.tanh(x @ w1 + b1)
    z = h @ w2 + b2
    return jax.nn.log_softmax(z, axis=-1)


def reference_forward_bf16(x, w1, b1, w2, b2):
    xb, w1b, w2b = (a.astype(jnp.bfloat16) for a in (x, w1, w2))
    h = jnp.tanh(jnp.dot(xb, w1b, preferred_element_type=jnp.float32) + b1)
    z = jnp.dot(h.astype(jnp.bfloat16), w2b, preferred_element_type=jnp.float32) + b2
    return jax.nn.log_softmax(z, axis=-1)


if __name__ == "__main__":
    # Small shapes consistent with the module's usage:
    #   batch=2 sequences of seq_len=8  ->  T_total = 16 packed frames
    #   input feature dim = 32, hidden_feature_dim = 32, num phones = 64
    batch, seq_len = 2, 8
    t_total = batch * seq_len
    in_dim, hidden_dim, num_phones = 32, 32, 64

    key = jax.random.PRNGKey(0)
    kx, kw1, kb1, kw2, kb2 = jax.random.split(key, 5)

    x = jax.random.normal(kx, (t_total, in_dim), dtype=jnp.float32)
    w1 = 0.1 * jax.random.normal(kw1, (in_dim, hidden_dim), dtype=jnp.float32)
    b1 = 0.1 * jax.random.normal(kb1, (1, hidden_dim), dtype=jnp.float32)
    w2 = 0.1 * jax.random.normal(kw2, (hidden_dim, num_phones), dtype=jnp.float32)
    b2 = 0.1 * jax.random.normal(kb2, (1, num_phones), dtype=jnp.float32)

    out = phone_type_writer_forward(x, w1, b1, w2, b2)
    out = jax.block_until_ready(out)
    assert out.shape == (t_total, num_phones)

    # Tight check vs a reference using the same bf16 matmul operands.
    ref_bf16 = reference_forward_bf16(x, w1, b1, w2, b2)
    assert jnp.allclose(out, ref_bf16, atol=2e-3, rtol=2e-3), "mismatch vs bf16 reference"

    # Loose check vs the full-f32 reference (bf16 operand rounding only).
    ref_f32 = reference_forward_f32(x, w1, b1, w2, b2)
    assert jnp.allclose(out, ref_f32, atol=5e-2, rtol=5e-2), "mismatch vs f32 reference"

    # log-softmax rows should sum to ~1 in prob space.
    assert jnp.allclose(jnp.sum(jnp.exp(out), axis=-1), 1.0, atol=1e-3)

    print("KERNEL_OK")
</pallas_src>

<mosaic_0001>
module attributes {stable_mosaic.version = 11 : i64} {
  func.func @ptw_kernel(%arg0: i32, %arg1: memref<8x32xf32, #tpu.memory_space<vmem>>, %arg2: memref<32x32xbf16, #tpu.memory_space<vmem>>, %arg3: memref<1x32xf32, #tpu.memory_space<vmem>>, %arg4: memref<32x64xbf16, #tpu.memory_space<vmem>>, %arg5: memref<1x64xf32, #tpu.memory_space<vmem>>, %arg6: memref<8x64xf32, #tpu.memory_space<vmem>>) attributes {dimension_semantics = [#tpu.dimension_semantics<parallel>], iteration_bounds = array<i64: 2>, scalar_prefetch = 0 : i64, scratch_operands = 0 : i64, tpu.core_type = #tpu.core_type<tc>, window_params = [{transform_indices = @transform_0, window_bounds = array<i64: 8, 32>}, {pipeline_mode = #tpu.pipeline_mode<synchronous>, transform_indices = @transform_1, window_bounds = array<i64: 32, 32>}, {pipeline_mode = #tpu.pipeline_mode<synchronous>, transform_indices = @transform_2, window_bounds = array<i64: 1, 32>}, {pipeline_mode = #tpu.pipeline_mode<synchronous>, transform_indices = @transform_3, window_bounds = array<i64: 32, 64>}, {pipeline_mode = #tpu.pipeline_mode<synchronous>, transform_indices = @transform_4, window_bounds = array<i64: 1, 64>}, {transform_indices = @transform_5, window_bounds = array<i64: 8, 64>}]} {
    %c0 = arith.constant 0 : index
    %c0_0 = arith.constant 0 : index
    %0 = vector.load %arg1[%c0, %c0_0] : memref<8x32xf32, #tpu.memory_space<vmem>>, vector<8x32xf32>
    %1 = arith.truncf %0 : vector<8x32xf32> to vector<8x32xbf16>
    %c0_1 = arith.constant 0 : index
    %c0_2 = arith.constant 0 : index
    %2 = vector.load %arg2[%c0_1, %c0_2] : memref<32x32xbf16, #tpu.memory_space<vmem>>, vector<32x32xbf16>
    %cst = arith.constant dense<0.000000e+00> : vector<8x32xf32>
    %3 = tpu.matmul %1, %2, %cst {dimension_numbers = #tpu.dot_dimension_numbers<[1], [0], [0], [1], [0, 0, 1, 1], [], []>} : vector<8x32xbf16>, vector<32x32xbf16>, vector<8x32xf32> -> vector<8x32xf32>
    %c0_3 = arith.constant 0 : index
    %c0_4 = arith.constant 0 : index
    %4 = vector.load %arg3[%c0_3, %c0_4] : memref<1x32xf32, #tpu.memory_space<vmem>>, vector<1x32xf32>
    %5 = vector.broadcast %4 : vector<1x32xf32> to vector<8x32xf32>
    %6 = arith.addf %3, %5 : vector<8x32xf32>
    %7 = math.tanh %6 : vector<8x32xf32>
    %8 = arith.truncf %7 : vector<8x32xf32> to vector<8x32xbf16>
    %c0_5 = arith.constant 0 : index
    %c0_6 = arith.constant 0 : index
    %9 = vector.load %arg4[%c0_5, %c0_6] : memref<32x64xbf16, #tpu.memory_space<vmem>>, vector<32x64xbf16>
    %cst_7 = arith.constant dense<0.000000e+00> : vector<8x64xf32>
    %10 = tpu.matmul %8, %9, %cst_7 {dimension_numbers = #tpu.dot_dimension_numbers<[1], [0], [0], [1], [0, 0, 1, 1], [], []>} : vector<8x32xbf16>, vector<32x64xbf16>, vector<8x64xf32> -> vector<8x64xf32>
    %c0_8 = arith.constant 0 : index
    %c0_9 = arith.constant 0 : index
    %11 = vector.load %arg5[%c0_8, %c0_9] : memref<1x64xf32, #tpu.memory_space<vmem>>, vector<1x64xf32>
    %12 = vector.broadcast %11 : vector<1x64xf32> to vector<8x64xf32>
    %13 = arith.addf %10, %12 : vector<8x64xf32>
    %cst_10 = arith.constant dense<0xFF800000> : vector<8xf32>
    %14 = vector.multi_reduction <maximumf>, %13, %cst_10 [1] : vector<8x64xf32> to vector<8xf32>
    %15 = vector.shape_cast %14 : vector<8xf32> to vector<8x1xf32>
    %16 = vector.broadcast %15 : vector<8x1xf32> to vector<8x64xf32>
    %17 = arith.subf %13, %16 : vector<8x64xf32>
    %18 = math.exp %17 : vector<8x64xf32>
    %cst_11 = arith.constant dense<0.000000e+00> : vector<8xf32>
    %19 = vector.multi_reduction <add>, %18, %cst_11 [1] : vector<8x64xf32> to vector<8xf32>
    %20 = vector.shape_cast %19 : vector<8xf32> to vector<8x1xf32>
    %21 = math.log %20 : vector<8x1xf32>
    %22 = arith.addf %21, %15 : vector<8x1xf32>
    %23 = vector.broadcast %22 : vector<8x1xf32> to vector<8x64xf32>
    %24 = arith.subf %13, %23 : vector<8x64xf32>
    %c0_12 = arith.constant 0 : index
    %c0_13 = arith.constant 0 : index
    %25 = vector.load %arg6[%c0_12, %c0_13] : memref<8x64xf32, #tpu.memory_space<vmem>>, vector<8x64xf32>
    tpu.vector_store %arg6[%c0_12, %c0_13], %24 {strides = array<i32>} : memref<8x64xf32, #tpu.memory_space<vmem>>, vector<8x64xf32>,
    return
  }
  func.func @transform_0(%arg0: i32) -> (i32, i32) {
    %c0_i32 = arith.constant 0 : i32
    %c0_i32_0 = arith.constant 0 : i32
    return %arg0, %c0_i32 : i32, i32
  }
  func.func @transform_1(%arg0: i32) -> (i32, i32) {
    %c0_i32 = arith.constant 0 : i32
    %c0_i32_0 = arith.constant 0 : i32
    %c0_i32_1 = arith.constant 0 : i32
    return %c0_i32, %c0_i32_0 : i32, i32
  }
  func.func @transform_2(%arg0: i32) -> (i32, i32) {
    %c0_i32 = arith.constant 0 : i32
    %c0_i32_0 = arith.constant 0 : i32
    %c0_i32_1 = arith.constant 0 : i32
    return %c0_i32, %c0_i32_0 : i32, i32
  }
  func.func @transform_3(%arg0: i32) -> (i32, i32) {
    %c0_i32 = arith.constant 0 : i32
    %c0_i32_0 = arith.constant 0 : i32
    %c0_i32_1 = arith.constant 0 : i32
    return %c0_i32, %c0_i32_0 : i32, i32
  }
  func.func @transform_4(%arg0: i32) -> (i32, i32) {
    %c0_i32 = arith.constant 0 : i32
    %c0_i32_0 = arith.constant 0 : i32
    %c0_i32_1 = arith.constant 0 : i32
    return %c0_i32, %c0_i32_0 : i32, i32
  }
  func.func @transform_5(%arg0: i32) -> (i32, i32) {
    %c0_i32 = arith.constant 0 : i32
    %c0_i32_0 = arith.constant 0 : i32
    return %arg0, %c0_i32 : i32, i32
  }
}

</mosaic_0001>

<bundles_post_ra>
// kernel: phone_type_writer_forward.1
= control target key start
LH: loop header
LB: loop body
LE: loop exit
PB: predicated region body
PF: predicated region fallthrough
CT: control target
= control target key end

     0   :  { %10 = vsyncpa [#allocation3], 0  ;;  %s757_s0 = inlined_call_operand.vmem [shape: f32[16,32], index: 0, kind: input, shape index: {}]   ;;  %s758_s1 = inlined_call_operand.vmem [shape: bf16[32,32], index: 1, kind: input, shape index: {}]   ;;  %s759_s2 = inlined_call_operand.vmem [shape: f32[1,32], index: 2, kind: input, shape index: {}]   ;;  %s760_s3 = inlined_call_operand.vmem [shape: bf16[32,64], index: 3, kind: input, shape index: {}]   ;;  %s761_s4 = inlined_call_operand.vmem [shape: f32[1,64], index: 4, kind: input, shape index: {}]   ;;  %s762_s5 = inlined_call_operand.hbm [shape: f32[16,64], index: 5, kind: output, shape index: {}]  }
   0x1   :  { %12 = vsyncpa [#allocation3 + $0x1], 0  ;;  %s634_s18 = smov 0   ;;  %s636_s19 = smov 0  }
   0x2   :  { %s638_s20 = smov 0   ;;  %s640_s21 = smov 0  }
   0x3 LB: > { %s655_s22 = sadd.s32 4294967295, %s599_s21   ;;  %s446_s23 = sadd.s32 4294967294, %s599_s21   ;;  %s599_s21 = sphi %s640_s21, %s768_s21   ;;  %s595_s20 = sphi %s638_s20, %s767_s20   ;;  %s591_s19 = sphi %s636_s19, %s766_s19   ;;  %s587_s18 = sphi %s634_s18, %s765_s18  }
   0x4   : > { %s659_s24 = sadd.s32 1, %s599_s21   ;;  %s135_s25 = sadd.s32 1, %s595_s20 }
   0x5   : > { %s132_s26 = ssub.s32 %s599_s21, %s659_s24  ;;  %p145_p0 = scmp.ne.s32.totalorder %s595_s20, %s591_s19 }
   0x6   : > { %p133_p1 = scmp.eq.s32.totalorder %s132_s26, 0  ;;  %p146_p2 = scmp.eq.s32.totalorder %s655_s22, 1 }
   0x7   : > { %p151_p3 = scmp.ne.s32.totalorder %s591_s19, %s587_s18  ;;  %p152_p4 = scmp.eq.s32.totalorder %s446_s23, 1 }
   0x8   : > { %s670_s27 = scalar_select %p133_p1, %s595_s20, %s135_s25  }
   0x9   : > { %p672_p5 = por %p146_p2, %p145_p0  ;;  %p676_p6 = por %p152_p4, %p151_p3 }
   0xa   : > { %p449_p7 = scmp.ge.s32.totalorder %s599_s21, 1  ;;  %p189_p8 = scmp.lt.s32.totalorder %s599_s21, 3 }
   0xc   : > { %p190_p9 = pnand %p449_p7, %p189_p8 }
   0xd   : > { %v527_v0 = vld [vmem:[%s758_s1] sm:$0xff] (!%p190_p9)   ;;  %v601_v1 = vmov (!%p190_p9), 0.0   ;;  %v528_v2 = vld [vmem:[%s758_s1 + $0x8] sm:$0xff] (!%p190_p9)   ;;  %vm602_vm0 = vmmov (!%p190_p9), 0   ;;  %p216_p10 = scmp.lt.s32.totalorder (!%p190_p9), %s655_s22, 1  ;;  %vm246_vm1 = vcmask (!%p190_p9), 261120  }
   0xe   : > { %193 = sbr.rel (%p190_p9) target bundleno = 801 (0x321), region = 40  ;;  %470 = vmatprep.subr.bf16.mxu0 (!%p190_p9), %v601_v1  ;;  %478 = vmatprep.subr.bf16.mxu1 (!%p190_p9), %v601_v1  ;;  %v529_v5 = vld [vmem:[%s760_s3] sm:$0xff] (!%p190_p9)   ;;  %v530_v6 = vld [vmem:[%s760_s3 + $0x8] sm:$0xff] (!%p190_p9)   ;;  %vm358_vm2 = vcmask (!%p190_p9), 523264   ;;  %s213_s6 = sand.u32 (!%p190_p9), 1, %s591_s19  }
   0xf   : > { %471 = vmatpush3.bf16.msra.mxu0 (!%p190_p9), %v527_v0  ;;  %474 = vmatprep.mubr.msk.bf16.mxu0 (!%p190_p9), %vm602_vm0, %v601_v1  ;;  %v452_v7 = vld [vmem:[%s759_s2] ss:$0 sm:$0xff] (!%p190_p9)  ;;  %s450_s7 = sshll.u32 (!%p190_p9), %s213_s6, 3  ;;  %s461_s8 = sshll.u32 (!%p190_p9), %s655_s22, 7 }
  0x10   : > { %472 = vmatprep.subr.bf16.mxu0 (!%p190_p9), %v601_v1  ;;  %482 = vmatprep.mubr.msk.bf16.mxu1 (!%p190_p9), %vm602_vm0, %v601_v1  ;;  %v456_v15 = vld [vmem:[%s761_s4] ss:$0 sm:$0xff] (!%p190_p9)  ;;  %s374_s14 = scalar_lea.sflag (!%p190_p9), [#allocation3], %s213_s6 }
  0x11   : > { %479 = vmatpush3.bf16.msra.mxu1 (!%p190_p9), %v529_v5 }
  0x12   : > { %480 = vmatprep.subr.bf16.mxu1 (!%p190_p9), %v601_v1 }
  0x13   : > { %473 = vmatpush3.bf16.msra.mxu0 (!%p190_p9), %v528_v2 }
  0x15   : > { %s217_s9 = scalar_select %p216_p10, %s655_s22, 1  ;;  %481 = vmatpush3.bf16.msra.mxu1 %v530_v6 }
  0x16   : > { %s603_s22 = smov [#allocation2]  }
  0x17   : > { %s451_s10 = sshll.u32 %s217_s9, 3  ;;  %s215_s9 = scalar_lea.vmem [#allocation2], %s450_s7 }
  0x18   : > { %s219_s13 = scalar_lea.vmem %s757_s0, %s451_s10  ;;  %s387_s10 = sshll.u32 %s215_s9, 4  ;;  %s716_s10 = int_to_ptr.vmem [resolvable:$true] %s387_s10 }
  0x19   : > { %v221_v3 = vld [vmem:[%s219_s13] sm:$0xff]  ;;  %s714_s13 = scalar_lea.hbm %s762_s5, %s461_s8  ;;  %s537_s15 = scalar_lea.vmem %s716_s10, 128 }
  0x1a   : > { %v222_v4 = vpack.c.bf16 %v221_v3, %v221_v3  ;;  %p538_p11 = scmp.ne.s32.totalorder %s716_s10, %s537_s15  ;;  %s541_s16 = sshll.u32 %s603_s22, 4  ;;  %s542_s16 = int_to_ptr.vmem [resolvable:$false] %s541_s16 }
  0x1b   : > { %s543_s17 = scalar_lea.vmem %s542_s16, 256  ;;  %p544_p0 = scmp.lt.s32.totalorder %s716_s10, %s542_s16 }
  0x1c   : > { %475 = vmatmul.mubr.msk.bf16.vlgmr.msra.gmra.mrb[0].mxu0 %vm246_vm1, %v222_v4  ;;  %p539_p12 = pnand %p538_p11, %p672_p5  ;;  %p545_p1 = scmp.lt.s32.totalorder %s543_s17, %s537_s15 }
  0x1e   : > { %p540_p13 = pneg %p539_p12  ;;  %p546_p2 = por %p545_p1, %p544_p0 }
  0x20   : > { %p547_p3 = pnand %p546_p2, %p540_p13 }
  0xef   : > { %v284_v8 = vpop.f32.mrb[0].mxu0 }
  0xf0   : > { %v285_v9 = vadd.f32 %v452_v7, %v284_v8  ;;  %v476_v10 = vpop.f32.mrb[1].mxu0 }
  0xf1   : > { %v287_v11 = vpop.f32.mrb[2].mxu0 }
  0xf2   : > { %531 = vtanh.f32 %v285_v9  ;;  %v477_v12 = vpop.f32.mrb[3].mxu0 }
  0xfc   : > { %v532_v13 = vpop.eup %531 }
  0xfd   : > { %v291_v14 = vpack.c.bf16 %v532_v13, %v532_v13 }
  0xff   : > { %483 = vmatmul.mubr.msk.bf16.vlgmr.msra.gmra.mrb[0].mxu1 %vm246_vm1, %v291_v14 }
 0x1d2   : > { %v352_v16 = vpop.f32.mrb[0].mxu1 }
 0x1d3   : > { %v353_v17 = vadd.f32 %v456_v15, %v352_v16  ;;  %v484_v18 = vpop.f32.mrb[1].mxu1 }
 0x1d4   : > { %v355_v19 = vpop.f32.mrb[2].mxu1 }
 0x1d5   : > { %v485_v20 = vpop.f32.mrb[3].mxu1  ;;  %v359_v21 = vsel %vm358_vm2, %v353_v17, -inf }
 0x1d6   : > { %360 = vmax.xlane.f32.xlu0 %v359_v21 }
 0x263   : > { %v361_v22 = vpop.xlane.xlu0 %360 }
 0x264   : > { %v362_v23 = vsub.f32 %v353_v17, %v361_v22 }
 0x266   : > { %v363_v24 = vmul.f32 1.442695, %v362_v23 }
 0x268   : > { %533 = vpow2.f32 %v363_v24 }
 0x272   : > { %v534_v25 = vpop.eup %533 }
 0x273   : > { %v365_v26 = vsel %vm358_vm2, %v534_v25, 0.0 }
 0x274   : > { %366 = vadd.xlane.f32.xlu0 %v365_v26 }
 0x301   : > { %v367_v27 = vpop.xlane.xlu0 %366 }
 0x302   : > { %535 = vlog2.f32 %v367_v27 }
 0x30c   : > { %v536_v28 = vpop.eup %535 }
 0x30d   : > { %v369_v29 = vmul.f32 0.6931472, %v536_v28 }
 0x30f   : > { %v370_v30 = vadd.f32 %v369_v29, %v361_v22 }
 0x311   : > { %v371_v31 = vsub.f32 %v353_v17, %v370_v30 }
 0x313   : > { %372 = vst.msk [vmem:[%s215_s9] sm:$0xff] %vm358_vm2, %v371_v31 }
 0x314   : > { %550 = shalt.err (!%p547_p3)
}
 0x315   : > { %s551_s23 = scalar_lea.hbm %s714_s13, 128  ;;  %s555_s30 = scalar_lea.hbm %s762_s5, 256 }
 0x316   : > { %p552_p4 = scmp.ne.s32.totalorder %s714_s13, %s551_s23  ;;  %p556_p9 = scmp.lt.u32.totalorder %s714_s13, %s762_s5 }
 0x317   : > { %p557_p10 = scmp.lt.u32.totalorder %s555_s30, %s551_s23  ;;  %p559_p12 = scmp.lt.u32.totalorder %s551_s23, %s714_s13 }
 0x318   : > { %p553_p7 = pnand %p552_p4, %p672_p5 }
 0x319   : > { %p558_p11 = por %p557_p10, %p556_p9 }
 0x31a   : > { %p554_p8 = pneg %p553_p7 }
 0x31b   : > { %p560_p13 = por %p559_p12, %p558_p11 }
 0x31d   : > { %p561_p0 = pnand %p560_p13, %p554_p8 }
 0x31f   : > { %564 = shalt.err (!%p561_p0)
}
 0x320   : > { %486 = dma.vmem_to_hbm [thread:$0]  (%p672_p5), %s716_s10, 128, %s714_s13, %s374_s14  }
 0x321 PF: > { %p492_p1 = scmp.ge.s32.totalorder %s599_s21, 2  ;;  %s399_s8 = sand.u32 1, %s587_s18  }
 0x322   : > { %s400_s9 = scalar_lea.sflag [#allocation3], %s399_s8 }
 0x323   : > { %p489_p2 = pnand %p492_p1, %p676_p6 }
 0x325   : > { %582 = dma.done.wait (!%p489_p2), %s400_s9, 128  }
 0x326   : > { %584 = vsyncadd (!%p489_p2), %s400_s9, 4294967168  ;;  %p15_p3 = scmp.ge.s32.totalorder %s659_s24, 4   ;;  %s765_s18 = smov %s591_s19 }
 0x327   : > { %s766_s19 = smov %s595_s20  ;;  %s767_s20 = smov %s670_s27 }
 0x328   : > { %s768_s21 = smov %s659_s24  ;;  %17 = sbr.rel (!%p15_p3) target bundleno = 3 (0x3), region = 75 }
 0x32f   :  { %405 = vsyncpa [#allocation3], 1 }
 0x330   :  { %407 = vsyncpa [#allocation3 + $0x1], 1 }

</bundles_post_ra>
